<compile_context>
chip_gen: v6e
topology: v6e:2x2x1
jax: 0.10.0
libtpu: 0.0.40
codegen_flags: <defaults>
</compile_context>

<pallas_src>
import functools

import jax
import jax.numpy as jnp
from jax.experimental import pallas as pl
from jax.experimental.pallas import tpu as pltpu


def _round_up(x: int, m: int) -> int:
    return ((x + m - 1) // m) * m


def _cdiv(a: int, b: int) -> int:
    return -(-a // b)


def _choose_batch_tile(B: int) -> int:
    """Rows of the batch handled per grid step.

    Small B -> one sublane-aligned tile.  Larger B -> at least 2 tiles (so the
    "parallel" batch axis can be sharded across v7x's two TensorCores) with
    up to 1024 rows/tile to amortize per-grid-step overhead and fill the
    256-deep v6e/v7x MXU while keeping the per-tile one-hot / output
    footprint well under the v7x 32 MiB scoped VMEM budget.
    """
    if B <= 256:
        return _round_up(B, 8)
    n_tiles = max(2, _cdiv(B, 1024))
    return _round_up(_cdiv(B, n_tiles), 8)


def _actor_kernel(ids_ref, fused_ref, b_ref, out_ref):
    # ids_ref  : (TB, 1)        int32 flat state ids for this batch tile
    # fused_ref: (s_pad, a_pad) fused Embedding@Linear table, VMEM-resident
    # b_ref    : (1, a_pad)     linear bias (padded, fp32)
    # out_ref  : (TB, a_pad)    logits tile (padded)
    tb = ids_ref.shape[0]
    s_pad = fused_ref.shape[0]

    ids = ids_ref[...]                                          # (TB, 1)
    col = jax.lax.broadcasted_iota(jnp.int32, (tb, s_pad), 1)   # (TB, s_pad)
    # Integer compare (safe on v5e: no bf16 VALU), then cast the 0/1 result.
    onehot = (col == ids).astype(fused_ref.dtype)               # (TB, s_pad)
    # NOTE: any id >= s_n selects only zero-padded rows -> all-zero logits
    # (torch's nn.Embedding would raise); inputs are assumed valid.

    # Gather + dense head as ONE MXU matmul against the fused (s_n, a_n)
    # table; one-hot values are exactly 0/1 so the selection is exact.
    logits = jnp.dot(onehot, fused_ref[...],
                     preferred_element_type=jnp.float32)        # (TB, a_pad)

    # Bias add folded into the single lane-dense epilogue store.
    # TODO(synk): for very large B with tiny a_n, pack a_pad/a_n batch rows
    # into each 128-lane output row to cut padded HBM writeback (perf review).
    out_ref[...] = (logits + b_ref[...]).astype(out_ref.dtype)


def prepare_embedding_agent_params(factors, embed_table, lin_w, lin_b,
                                   compute_dtype=jnp.float32):
    """One-time parameter preparation (hoisted out of the per-call path).

    Fuses Embedding∘Linear into a single (s_n, a_n) table, pads it to a
    lane-dense (s_pad, a_pad) layout, pads the bias, and builds the
    State2ID mixed-radix strides.
    """
    s_n, _e_dim = embed_table.shape
    a_n = lin_w.shape[1]

    a_pad = _round_up(a_n, 128)   # lane-dense fused table / bias / output
    s_pad = _round_up(s_n, 8)     # sublane-aligned table rows

    # fp32-accurate fusion (matches the fp32 PyTorch module); optionally cast
    # the small fused table to bf16 afterwards for the bf16-native MXUs.
    fused = jnp.dot(embed_table.astype(jnp.float32),
                    lin_w.astype(jnp.float32),
                    precision=jax.lax.Precision.HIGHEST)         # (s_n, a_n)
    fused_p = jnp.zeros((s_pad, a_pad), compute_dtype)
    fused_p = fused_p.at[:s_n, :a_n].set(fused.astype(compute_dtype))
    bias_p = jnp.zeros((1, a_pad), jnp.float32).at[0, :a_n].set(
        lin_b.astype(jnp.float32))

    # State2ID strides (row-major mixed-radix ravel).
    # TODO(synk): int32 strides overflow if prod(factors) >= 2^31 (not here).
    factors = jnp.asarray(factors, jnp.int32)
    strides = jnp.concatenate(
        [jnp.cumprod(factors[::-1])[::-1][1:], jnp.array([1], jnp.int32)]
    ).astype(jnp.int32)

    return fused_p, bias_p, strides, a_n


@functools.partial(jax.jit, static_argnames=("a_n",))
def embedding_agent_forward(state, strides, fused_p, bias_p, a_n):
    """Pallas EmbeddingAgent.forward: (B, F) int states -> (B, a_n) logits."""
    B = state.shape[0]
    s_pad, a_pad = fused_p.shape

    # State2ID glue: flat state ids (tiny elementwise ops, stays in wrapper).
    ids = jnp.sum(state.astype(jnp.int32) * strides[None, :], axis=1)  # (B,)

    TB = _choose_batch_tile(B)
    B_pad = _round_up(B, TB)
    ids2 = ids[:, None]
    if B_pad != B:
        ids2 = jnp.pad(ids2, ((0, B_pad - B), (0, 0)))

    nb = B_pad // TB

    out_padded = pl.pallas_call(
        _actor_kernel,
        out_shape=jax.ShapeDtypeStruct((B_pad, a_pad), jnp.float32),
        grid=(nb,),
        in_specs=[
            # per-tile state ids: the only per-step input DMA
            pl.BlockSpec((TB, 1), lambda i: (i, 0)),
            # fused Embedding@Linear table: VMEM-resident across the grid
            # (s_pad*a_pad*4 bytes; re-derive vs the ~24 MiB v7x budget if
            #  s_n grows — chunk s_n over a grid axis beyond that)
            pl.BlockSpec((s_pad, a_pad), lambda i: (0, 0)),
            # bias: resident
            pl.BlockSpec((1, a_pad), lambda i: (0, 0)),
        ],
        out_specs=pl.BlockSpec((TB, a_pad), lambda i: (i, 0)),
        compiler_params=pltpu.CompilerParams(
            # independent output tiles -> shard batch axis across v7x's 2 TCs
            dimension_semantics=("parallel",),
            # safe on v7x's 32 MiB scoped VMEM; raise toward 128 MiB on
            # v5e/v6e only if the fused table ever grows that large
            vmem_limit_bytes=32 * 1024 * 1024,
        ),
    )(ids2, fused_p, bias_p)

    return out_padded[:B, :a_n]


if __name__ == "__main__":
    # Small, deterministic configuration consistent with the module:
    #   s_n = (4, 4, 4) -> 64 states, a_n = 4 actions, e_dim = 128, batch = 8.
    factors_t = (4, 4, 4)
    a_n = 4
    e_dim = 128
    B = 8

    key = jax.random.PRNGKey(0)
    k_emb, k_w, k_b, k_state = jax.random.split(key, 4)

    factors = jnp.array(factors_t, dtype=jnp.int32)
    s_n = int(jnp.prod(factors))

    # nn.Embedding default init: N(0, 1)
    embed_table = jax.random.normal(k_emb, (s_n, e_dim), dtype=jnp.float32)
    # nn.Linear default init: U(-1/sqrt(fan_in), 1/sqrt(fan_in))
    bound = 1.0 / (e_dim ** 0.5)
    lin_w = jax.random.uniform(
        k_w, (e_dim, a_n), minval=-bound, maxval=bound, dtype=jnp.float32
    )
    lin_b = jax.random.uniform(
        k_b, (a_n,), minval=-bound, maxval=bound, dtype=jnp.float32
    )

    # Deterministic integer states within the factor ranges.
    state = jax.random.randint(
        k_state, (B, len(factors_t)), minval=0,
        maxval=jnp.array(factors_t), dtype=jnp.int32
    )

    # One-time parameter prep (fusion + padding), then per-call forward.
    fused_p, bias_p, strides, a_n_out = prepare_embedding_agent_params(
        factors, embed_table, lin_w, lin_b
    )
    logits = embedding_agent_forward(state, strides, fused_p, bias_p, a_n_out)
    logits = jax.block_until_ready(logits)

    # Pure-JAX reference (fp32 matmul precision to mirror the torch module).
    ids_ref = jnp.sum(state * strides[None, :], axis=1)
    ref = jnp.dot(embed_table[ids_ref], lin_w,
                  precision=jax.lax.Precision.HIGHEST) + lin_b[None, :]

    assert logits.shape == (B, a_n)
    assert jnp.allclose(logits, ref, atol=1e-5, rtol=1e-5)

    print("KERNEL_OK")
</pallas_src>

<mosaic_0001>
module attributes {stable_mosaic.version = 11 : i64} {
  func.func @_actor_kernel(%arg0: i32, %arg1: memref<8x1xi32, #tpu.memory_space<vmem>>, %arg2: memref<64x128xf32, #tpu.memory_space<vmem>>, %arg3: memref<1x128xf32, #tpu.memory_space<vmem>>, %arg4: memref<8x128xf32, #tpu.memory_space<vmem>>) attributes {dimension_semantics = [#tpu.dimension_semantics<parallel>], iteration_bounds = array<i64: 1>, scalar_prefetch = 0 : i64, scratch_operands = 0 : i64, tpu.core_type = #tpu.core_type<tc>, window_params = [{transform_indices = @transform_0, window_bounds = array<i64: 8, 1>}, {pipeline_mode = #tpu.pipeline_mode<synchronous>, transform_indices = @transform_1, window_bounds = array<i64: 64, 128>}, {pipeline_mode = #tpu.pipeline_mode<synchronous>, transform_indices = @transform_2, window_bounds = array<i64: 1, 128>}, {transform_indices = @transform_3, window_bounds = array<i64: 8, 128>}]} {
    %c0 = arith.constant 0 : index
    %c0_0 = arith.constant 0 : index
    %0 = vector.load %arg1[%c0, %c0_0] : memref<8x1xi32, #tpu.memory_space<vmem>>, vector<8x1xi32>
    %1 = tpu.iota {dimensions = array<i32: 1>} : vector<8x64xi32>
    %2 = vector.broadcast %0 : vector<8x1xi32> to vector<8x64xi32>
    %3 = arith.cmpi eq, %1, %2 : vector<8x64xi32>
    %4 = arith.extui %3 : vector<8x64xi1> to vector<8x64xi32>
    %5 = arith.sitofp %4 : vector<8x64xi32> to vector<8x64xf32>
    %c0_1 = arith.constant 0 : index
    %c0_2 = arith.constant 0 : index
    %6 = vector.load %arg2[%c0_1, %c0_2] : memref<64x128xf32, #tpu.memory_space<vmem>>, vector<64x128xf32>
    %cst = arith.constant dense<0.000000e+00> : vector<8x128xf32>
    %7 = tpu.matmul %5, %6, %cst {dimension_numbers = #tpu.dot_dimension_numbers<[1], [0], [0], [1], [0, 0, 1, 1], [], []>} : vector<8x64xf32>, vector<64x128xf32>, vector<8x128xf32> -> vector<8x128xf32>
    %c0_3 = arith.constant 0 : index
    %c0_4 = arith.constant 0 : index
    %8 = vector.load %arg3[%c0_3, %c0_4] : memref<1x128xf32, #tpu.memory_space<vmem>>, vector<1x128xf32>
    %9 = vector.broadcast %8 : vector<1x128xf32> to vector<8x128xf32>
    %10 = arith.addf %7, %9 : vector<8x128xf32>
    %c0_5 = arith.constant 0 : index
    %c0_6 = arith.constant 0 : index
    %11 = vector.load %arg4[%c0_5, %c0_6] : memref<8x128xf32, #tpu.memory_space<vmem>>, vector<8x128xf32>
    tpu.vector_store %arg4[%c0_5, %c0_6], %10 {strides = array<i32>} : memref<8x128xf32, #tpu.memory_space<vmem>>, vector<8x128xf32>,
    return
  }
  func.func @transform_0(%arg0: i32) -> (i32, i32) {
    %c0_i32 = arith.constant 0 : i32
    %c0_i32_0 = arith.constant 0 : i32
    return %arg0, %c0_i32 : i32, i32
  }
  func.func @transform_1(%arg0: i32) -> (i32, i32) {
    %c0_i32 = arith.constant 0 : i32
    %c0_i32_0 = arith.constant 0 : i32
    %c0_i32_1 = arith.constant 0 : i32
    return %c0_i32, %c0_i32_0 : i32, i32
  }
  func.func @transform_2(%arg0: i32) -> (i32, i32) {
    %c0_i32 = arith.constant 0 : i32
    %c0_i32_0 = arith.constant 0 : i32
    %c0_i32_1 = arith.constant 0 : i32
    return %c0_i32, %c0_i32_0 : i32, i32
  }
  func.func @transform_3(%arg0: i32) -> (i32, i32) {
    %c0_i32 = arith.constant 0 : i32
    %c0_i32_0 = arith.constant 0 : i32
    return %arg0, %c0_i32 : i32, i32
  }
}

</mosaic_0001>

<bundles_post_ra>
// kernel: embedding_agent_forward.1
= control target key start
LH: loop header
LB: loop body
LE: loop exit
PB: predicated region body
PF: predicated region fallthrough
CT: control target
= control target key end

     0   :  { %8 = vsyncpa [#allocation3], 0  ;;  %s192_s12 = smov [#allocation2]   ;;  %s230_s0 = inlined_call_operand.vmem [shape: s32[8,1], index: 0, kind: input, shape index: {}]   ;;  %s231_s1 = inlined_call_operand.hbm [shape: f32[64,128], index: 1, kind: input, shape index: {}]   ;;  %s232_s2 = inlined_call_operand.vmem [shape: f32[1,128], index: 2, kind: input, shape index: {}]   ;;  %s233_s3 = inlined_call_operand.vmem [shape: f32[8,128], index: 3, kind: output, shape index: {}]  }
   0x1   :  { %s16_s13 = sshll.u32 %s192_s12, 4  ;;  %s17_s13 = int_to_ptr.vmem [resolvable:$true] %s16_s13 }
   0x2   :  { %s178_s14 = scalar_lea.vmem %s17_s13, 1024  ;;  %p183_p1 = scmp.lt.s32.totalorder %s17_s13, %s17_s13 }
   0x3   :  { %p179_p0 = scmp.ne.s32.totalorder %s17_s13, %s178_s14  ;;  %p184_p2 = scmp.lt.s32.totalorder %s178_s14, %s178_s14 }
   0x5   :  { %p185_p3 = por %p184_p2, %p183_p1 }
   0x7   :  { %p186_p4 = pnand %p185_p3, %p179_p0 }
   0x9   :  { %189 = shalt.err (!%p186_p4)
}
   0xa   :  { %s193_s15 = smov 128   ;;  %s194_s16 = smov 8  }
   0xb   :  { %22 = dma.hbm_to_vmem [thread:$0]  %s231_s1, 1024, %s17_s13, [#allocation3], %s193_s15, %s193_s15, %s194_s16  }
   0xc   :  { %190 = dma.done.wait [#allocation3], 1024  }
   0xd   :  { %191 = vsyncadd [#allocation3], 4294966272  ;;  %v195_v0 = vmov 0   ;;  %v196_v1 = vmov 0.0   ;;  %vm197_vm0 = vmmov 0   ;;  %v28_v2 = vld [vmem:[%s230_s0] sm:$0xff]  ;;  %v29_v11 = vlaneseq }
   0xe   :  { %169 = vset.pattern.permute.xlu0 %v195_v0  ;;  %144 = vmatprep.subr.mxu0 %v196_v1  ;;  %v44_v3 = vld [vmem:[#allocation2 + $0x38] sm:$0xff]  ;;  %v43_v4 = vld [vmem:[#allocation2 + $0x30] sm:$0xff]  ;;  %v42_v5 = vld [vmem:[#allocation2 + $0x28] sm:$0xff]  ;;  %vm52_vm1 = vcmask 523264  }
   0xf   :  { %160 = vmatprep.mubr.msk.f32.mxu0 %vm197_vm0, %v196_v1  ;;  %32 = vperm.xlu0 %169, %v28_v2   ;;  %v41_v6 = vld [vmem:[#allocation2 + $0x20] sm:$0xff]  ;;  %v40_v7 = vld [vmem:[#allocation2 + $0x18] sm:$0xff]  ;;  %v39_v8 = vld [vmem:[#allocation2 + $0x10] sm:$0xff]  ;;  %v30_v12 = vand.u32 127, %v29_v11 }
  0x10   :  { %145 = vmatpush3.msra.mxu0 %v44_v3  ;;  %v38_v9 = vld [vmem:[#allocation2 + $0x8] sm:$0xff]  ;;  %v37_v10 = vld [vmem:[#allocation2] sm:$0xff] }
  0x11   :  { %146 = vmatprep.subr.mxu0 %v196_v1  ;;  %v133_v15 = vld [vmem:[%s232_s2] ss:$0 sm:$0xff] }
  0x12   :  { %147 = vmatpush3.msra.mxu0 %v43_v4 }
  0x13   :  { %148 = vmatprep.subr.mxu0 %v196_v1 }
  0x14   :  { %149 = vmatpush3.msra.mxu0 %v42_v5 }
  0x15   :  { %150 = vmatprep.subr.mxu0 %v196_v1 }
  0x16   :  { %151 = vmatpush3.msra.mxu0 %v41_v6 }
  0x17   :  { %152 = vmatprep.subr.mxu0 %v196_v1 }
  0x18   :  { %153 = vmatpush3.msra.mxu0 %v40_v7 }
  0x19   :  { %154 = vmatprep.subr.mxu0 %v196_v1 }
  0x1a   :  { %155 = vmatpush3.msra.mxu0 %v39_v8 }
  0x1b   :  { %156 = vmatprep.subr.mxu0 %v196_v1 }
  0x1c   :  { %157 = vmatpush3.msra.mxu0 %v38_v9 }
  0x1d   :  { %158 = vmatprep.subr.mxu0 %v196_v1 }
  0x1e   :  { %159 = vmatpush3.msra.mxu0 %v37_v10 }
  0x8a   :  { %v33_v13 = vpop.permute.xlu0 %32 }
  0x8b   :  { %vm34_vm2 = vcmp.eq.s32.totalorder %v30_v12, %v33_v13 }
  0x8c   :  { %v132_v14 = vsel %vm34_vm2, 1.0, %v196_v1 }
  0x8d   :  { %161 = vmatmul.mubr.msk.f32.vlgmr.msra.gmra.mxu0 %vm52_vm1, %v132_v14 }
 0x14d   :  { %v122_v16 = vpop.f32.mrf.mxu0 }
 0x14e   :  { %v123_v17 = vadd.f32 %v133_v15, %v122_v16 }
 0x14f   :  { %v162_v18 = vpop.f32.mrf.mxu0 }
 0x150   :  { %126 = vst [vmem:[%s233_s3] sm:$0xff] %v123_v17 }
 0x151   :  { %131 = vsyncpa [#allocation3], 1 }

</bundles_post_ra>
